<compile_context>
chip_gen: v5e
topology: v5e:2x2
jax: 0.10.0
libtpu: 0.0.40
codegen_flags: <defaults>
</compile_context>

<pallas_src>
import numpy as np
import jax
import jax.numpy as jnp
from jax.experimental import pallas as pl
from jax.experimental.pallas import tpu as pltpu

_LANE = 128
_SUBLANE = 8


def _phase_kernel(w_ref, xr_ref, xi_ref, or_ref, oi_ref):
    # w_ref: (1, tl) f32; x*_ref / o*_ref: (bb, tl) f32.
    ang = (2.0 * jnp.pi) * jax.nn.sigmoid(w_ref[...])
    xr = xr_ref[...]
    xi = xi_ref[...]
    # Broadcast c/s once (JAX does not CSE broadcast_in_dim).
    c = jnp.broadcast_to(jnp.cos(ang), xr.shape)
    s = jnp.broadcast_to(jnp.sin(ang), xr.shape)
    # (xr + i*xi) * (c + i*s)
    or_ref[...] = xr * c - xi * s
    oi_ref[...] = xr * s + xi * c


def _round_up(x, m):
    return -(-int(x) // m) * m


def _vmem_budget():
    """Pick (vmem_limit_bytes, per-activation-block byte budget) per chip."""
    try:
        phys = int(pltpu.get_tpu_info().vmem_capacity_bytes)
    except Exception:
        phys = 64 << 20                      # conservative fallback (v7x per-TC VMEM)
    vmem_limit = min(phys // 2, 48 << 20)    # 48 MiB on v5e/v6e (128 MiB), 32 MiB on v7x
    # Footprint ~= 4 activation planes (xr, xi, or, oi) x 2 pipeline buffers
    # + ~1 weight-block equivalent = ~9 blocks; keep ~30% headroom.
    target_block_bytes = (vmem_limit * 7 // 10) // 9
    return vmem_limit, target_block_bytes


def _choose_tiles(B, L, target_block_bytes):
    """Choose (bb, tl): batch block and flattened-spatial (lane) block sizes."""
    # Batch block: whole batch when it fits the budget (VMEM accounting uses
    # the sublane-padded row count); large B is split across a grid axis.
    bb_cap = max(_SUBLANE, (target_block_bytes // (_LANE * 4) // _SUBLANE) * _SUBLANE)
    bb = B if B <= bb_cap else bb_cap
    padded_b = _round_up(bb, _SUBLANE)

    # Lane block along the flattened spatial axis: multiple of 128 (or the
    # full axis), as large as the budget allows -> long unmasked vst runs.
    budget_elems = max(_LANE, target_block_bytes // (padded_b * 4))
    if L <= _LANE or budget_elems >= L:
        tl = L
    else:
        tl = max(_LANE, (budget_elems // _LANE) * _LANE)

    # Guarantee >= 2 grid steps along a parallel axis when the problem allows,
    # so v7x's second TensorCore is not stranded (negligible cost on 1-TC chips).
    if pl.cdiv(L, tl) * pl.cdiv(B, bb) < 2:
        if L > _LANE:
            tl = max(_LANE, _round_up(pl.cdiv(L, 2), _LANE))
        elif B >= 2:
            bb = int(pl.cdiv(B, 2))
    return bb, tl


def phase_layer(weight, x_real, x_imag):
    """Apply PhaseLayer. weight: (row, col); x_real/x_imag: (B, row, col)."""
    B, row, col = x_real.shape
    assert weight.shape == (row, col)
    L = row * col

    # Free, layout-preserving reshapes: merge the trailing spatial dims so the
    # kernel sees one long lane-dense axis shared by x and weight.
    w2 = weight.astype(jnp.float32).reshape(1, L)
    xr2 = x_real.astype(jnp.float32).reshape(B, L)
    xi2 = x_imag.astype(jnp.float32).reshape(B, L)

    vmem_limit, target_block_bytes = _vmem_budget()
    bb, tl = _choose_tiles(B, L, target_block_bytes)
    # L outer, batch inner: the weight tile index is constant across the inner
    # batch steps, so its block is not re-fetched.
    grid = (pl.cdiv(L, tl), pl.cdiv(B, bb))

    grid_spec = pltpu.PrefetchScalarGridSpec(
        num_scalar_prefetch=0,
        grid=grid,
        in_specs=[
            pl.BlockSpec((1, tl), lambda l, b: (0, l)),    # weight tile (batch-invariant)
            pl.BlockSpec((bb, tl), lambda l, b: (b, l)),   # x real
            pl.BlockSpec((bb, tl), lambda l, b: (b, l)),   # x imag
        ],
        out_specs=[
            pl.BlockSpec((bb, tl), lambda l, b: (b, l)),   # out real
            pl.BlockSpec((bb, tl), lambda l, b: (b, l)),   # out imag
        ],
    )

    out_r, out_i = pl.pallas_call(
        _phase_kernel,
        out_shape=(jax.ShapeDtypeStruct((B, L), jnp.float32),
                   jax.ShapeDtypeStruct((B, L), jnp.float32)),
        grid_spec=grid_spec,
        compiler_params=pltpu.CompilerParams(
            dimension_semantics=("parallel", "parallel"),
            vmem_limit_bytes=vmem_limit),
        cost_estimate=pl.CostEstimate(
            flops=6 * B * L,              # 4 mul + 2 add per complex element
            transcendentals=3 * L,        # sigmoid, cos, sin per weight element
            bytes_accessed=16 * B * L + 4 * L),
    )(w2, xr2, xi2)

    return out_r.reshape(B, row, col), out_i.reshape(B, row, col)


if __name__ == "__main__":
    # Small shapes consistent with the module: weight (row, col), input (B, row, col).
    B, row, col = 2, 8, 128

    key = jax.random.PRNGKey(0)
    kw, kr, ki = jax.random.split(key, 3)
    weight = jax.random.normal(kw, (row, col), dtype=jnp.float32)   # ~ torch.randn(row, col)
    x_real = jax.random.normal(kr, (B, row, col), dtype=jnp.float32)
    x_imag = jax.random.normal(ki, (B, row, col), dtype=jnp.float32)

    out_r, out_i = phase_layer(weight, x_real, x_imag)
    out_r = jax.block_until_ready(out_r)
    out_i = jax.block_until_ready(out_i)

    # Pure-JAX reference (complex arithmetic) to check semantics.
    phase = jax.nn.sigmoid(weight)
    tem = jnp.exp(1j * 2.0 * np.pi * phase.astype(jnp.complex64))
    ref = (x_real + 1j * x_imag) * tem[None, :, :]
    np.testing.assert_allclose(np.asarray(out_r), np.asarray(ref.real),
                               rtol=1e-5, atol=1e-5)
    np.testing.assert_allclose(np.asarray(out_i), np.asarray(ref.imag),
                               rtol=1e-5, atol=1e-5)

    print("KERNEL_OK")
</pallas_src>

<mosaic_0001>
module attributes {stable_mosaic.version = 11 : i64} {
  func.func @_phase_kernel(%arg0: i32, %arg1: i32, %arg2: memref<1x512xf32, #tpu.memory_space<vmem>>, %arg3: memref<2x512xf32, #tpu.memory_space<vmem>>, %arg4: memref<2x512xf32, #tpu.memory_space<vmem>>, %arg5: memref<2x512xf32, #tpu.memory_space<vmem>>, %arg6: memref<2x512xf32, #tpu.memory_space<vmem>>) attributes {dimension_semantics = [#tpu.dimension_semantics<parallel>, #tpu.dimension_semantics<parallel>], iteration_bounds = array<i64: 2, 1>, scalar_prefetch = 0 : i64, scratch_operands = 0 : i64, tpu.core_type = #tpu.core_type<tc>, window_params = [{transform_indices = @transform_0, window_bounds = array<i64: 1, 512>}, {transform_indices = @transform_1, window_bounds = array<i64: 2, 512>}, {transform_indices = @transform_2, window_bounds = array<i64: 2, 512>}, {transform_indices = @transform_3, window_bounds = array<i64: 2, 512>}, {transform_indices = @transform_4, window_bounds = array<i64: 2, 512>}]} {
    %c0 = arith.constant 0 : index
    %c0_0 = arith.constant 0 : index
    %0 = vector.load %arg2[%c0, %c0_0] : memref<1x512xf32, #tpu.memory_space<vmem>>, vector<1x512xf32>
    %1 = arith.negf %0 : vector<1x512xf32>
    %2 = math.exp %1 : vector<1x512xf32>
    %cst = arith.constant 1.000000e+00 : f32
    %3 = vector.broadcast %cst : f32 to vector<1x512xf32>
    %4 = arith.addf %3, %2 : vector<1x512xf32>
    %5 = arith.divf %3, %4 : vector<1x512xf32>
    %cst_1 = arith.constant 6.28318548 : f32
    %6 = vector.broadcast %cst_1 : f32 to vector<1x512xf32>
    %7 = arith.mulf %6, %5 : vector<1x512xf32>
    %c0_2 = arith.constant 0 : index
    %c0_3 = arith.constant 0 : index
    %8 = vector.load %arg3[%c0_2, %c0_3] : memref<2x512xf32, #tpu.memory_space<vmem>>, vector<2x512xf32>
    %c0_4 = arith.constant 0 : index
    %c0_5 = arith.constant 0 : index
    %9 = vector.load %arg4[%c0_4, %c0_5] : memref<2x512xf32, #tpu.memory_space<vmem>>, vector<2x512xf32>
    %10 = math.cos %7 : vector<1x512xf32>
    %11 = vector.shape_cast %10 : vector<1x512xf32> to vector<1x512xf32>
    %12 = vector.broadcast %11 : vector<1x512xf32> to vector<2x512xf32>
    %13 = math.sin %7 : vector<1x512xf32>
    %14 = vector.shape_cast %13 : vector<1x512xf32> to vector<1x512xf32>
    %15 = vector.broadcast %14 : vector<1x512xf32> to vector<2x512xf32>
    %16 = arith.mulf %8, %12 : vector<2x512xf32>
    %17 = arith.mulf %9, %15 : vector<2x512xf32>
    %18 = arith.subf %16, %17 : vector<2x512xf32>
    %c0_6 = arith.constant 0 : index
    %c0_7 = arith.constant 0 : index
    %19 = vector.load %arg5[%c0_6, %c0_7] : memref<2x512xf32, #tpu.memory_space<vmem>>, vector<2x512xf32>
    tpu.vector_store %arg5[%c0_6, %c0_7], %18 {strides = array<i32>} : memref<2x512xf32, #tpu.memory_space<vmem>>, vector<2x512xf32>,
    %20 = arith.mulf %8, %15 : vector<2x512xf32>
    %21 = arith.mulf %9, %12 : vector<2x512xf32>
    %22 = arith.addf %20, %21 : vector<2x512xf32>
    %c0_8 = arith.constant 0 : index
    %c0_9 = arith.constant 0 : index
    %23 = vector.load %arg6[%c0_8, %c0_9] : memref<2x512xf32, #tpu.memory_space<vmem>>, vector<2x512xf32>
    tpu.vector_store %arg6[%c0_8, %c0_9], %22 {strides = array<i32>} : memref<2x512xf32, #tpu.memory_space<vmem>>, vector<2x512xf32>,
    return
  }
  func.func @transform_0(%arg0: i32, %arg1: i32) -> (i32, i32) {
    %c0_i32 = arith.constant 0 : i32
    %c0_i32_0 = arith.constant 0 : i32
    return %c0_i32, %arg0 : i32, i32
  }
  func.func @transform_1(%arg0: i32, %arg1: i32) -> (i32, i32) {
    %c0_i32 = arith.constant 0 : i32
    return %arg1, %arg0 : i32, i32
  }
  func.func @transform_2(%arg0: i32, %arg1: i32) -> (i32, i32) {
    %c0_i32 = arith.constant 0 : i32
    return %arg1, %arg0 : i32, i32
  }
  func.func @transform_3(%arg0: i32, %arg1: i32) -> (i32, i32) {
    %c0_i32 = arith.constant 0 : i32
    return %arg1, %arg0 : i32, i32
  }
  func.func @transform_4(%arg0: i32, %arg1: i32) -> (i32, i32) {
    %c0_i32 = arith.constant 0 : i32
    return %arg1, %arg0 : i32, i32
  }
}

</mosaic_0001>

<bundles_post_ra>
// kernel: tpu_custom_call.1
= control target key start
LH: loop header
LB: loop body
LE: loop exit
PB: predicated region body
PF: predicated region fallthrough
CT: control target
= control target key end

     0   :  { %s1513_s0 = inlined_call_operand.hbm [shape: f32[1,1024], index: 0, kind: input, shape index: {}]   ;;  %s1514_s1 = inlined_call_operand.hbm [shape: f32[2,1024], index: 1, kind: input, shape index: {}]   ;;  %s1515_s2 = inlined_call_operand.hbm [shape: f32[2,1024], index: 2, kind: input, shape index: {}]   ;;  %s1516_s3 = inlined_call_operand.hbm [shape: f32[2,1024], index: 3, kind: output, shape index: {0}]   ;;  %s1517_s4 = inlined_call_operand.hbm [shape: f32[2,1024], index: 4, kind: output, shape index: {1}]  }
   0x1   :  { %1520 = sst [smem:[#allocation18_spill]] %s1514_s1 }
   0x2   :  { %10 = vsyncpa [#allocation3], 0 }
   0x3   :  { %12 = vsyncpa [#allocation3 + $0x1], 0 }
   0x4   :  { %13 = vsyncpa [#allocation6], 0 }
   0x5   :  { %15 = vsyncpa [#allocation6 + $0x1], 0 }
   0x6   :  { %16 = vsyncpa [#allocation4], 0 }
   0x7   :  { %18 = vsyncpa [#allocation4 + $0x1], 0 }
   0x8   :  { %19 = vsyncpa [#allocation10], 0 }
   0x9   :  { %21 = vsyncpa [#allocation10 + $0x1], 0  ;;  %s1273_s15 = smov 0   ;;  %s1275_s16 = smov 0  }
   0xa   :  { %s1277_s17 = smov 0   ;;  %s1279_s18 = smov 0  }
   0xb   :  { %s1281_s19 = smov 0   ;;  %s1283_s20 = smov 0  }
   0xc LB: > { %1521 = sst [smem:[#allocation15_spill]] %s1227_s17  ;;  %s1304_s21 = sadd.s32 4294967295, %s1239_s20   ;;  %s1239_s20 = sphi %s1283_s20, %s27_s20   ;;  %s1235_s19 = sphi %s1281_s19, %s1537_s19   ;;  %s1231_s18 = sphi %s1279_s18, %s1536_s18   ;;  %s1227_s17 = sphi %s1277_s17, %s1532_s17   ;;  %s1223_s16 = sphi %s1275_s16, %s1535_s16   ;;  %s1219_s15 = sphi %s1273_s15, %s1534_s15  }
   0xd   : > { %s907_s22 = sadd.s32 4294967294, %s1239_s20   ;;  %s39_s23 = sadd.s32 1, %s1235_s19 }
   0xe   : > { %s46_s24 = sadd.s32 1, %s1227_s17  ;;  %p41_p0 = scmp.ge.s32.totalorder %s39_s23, 2 }
   0xf   : > { %p53_p1 = scmp.ne.s32.totalorder %s1227_s17, %s1223_s16  ;;  %p54_p2 = scmp.eq.s32.totalorder %s1239_s20, 0 }
  0x10   : > { %p59_p3 = scmp.ne.s32.totalorder %s1223_s16, %s1219_s15  ;;  %s1539_s23 = smov (%p41_p0, %s39_s23), 0 }
  0x11   : > { %1522 = sst [smem:[#allocation16_spill]] %s1539_s23  ;;  %p1316_p4 = por %p54_p2, %p53_p1 }
  0x12   : > { %p60_p5 = scmp.eq.s32.totalorder %s1304_s21, 0  ;;  %s43_s26 = ssub.s32 %s1235_s19, %s1539_s23 }
  0x13   : > { %p141_p6 = scmp.eq.s32.totalorder %s1304_s21, 1  ;;  %p44_p7 = scmp.eq.s32.totalorder %s43_s26, 0 }
  0x14   : > { %p1324_p8 = por %p60_p5, %p59_p3  ;;  %p147_p10 = scmp.eq.s32.totalorder %s907_s22, 1 }
  0x15   : > { %p1328_p9 = por %p141_p6, %p53_p1  ;;  %p909_p12 = scmp.ge.s32.totalorder %s1239_s20, 2 }
  0x16   : > { %s1333_s29 = scalar_select %p44_p7, %s1227_s17, %s46_s24  }
  0x17   : > { %p1335_p11 = por %p147_p10, %p59_p3  ;;  %p970_p13 = scmp.lt.s32.totalorder %s1239_s20, 2 }
  0x18   : > { %1526 = sst [smem:[#allocation17_spill]] %s1333_s29  ;;  %s195_s5 = sand.u32 1, %s1227_s17  }
  0x19   : > { %s214_s6 = sand.u32 1, %s1239_s20   ;;  %s912_s7 = sshll.u32 %s195_s5, 3 }
  0x1a   : > { %p1345_p0 = pnand %p970_p13, %p1316_p4  ;;  %s939_s9 = sshll.u32 %s1235_s19, 3 }
  0x1b   : > { %s1529_s1 = sld [smem:[#allocation18_spill]]  ;;  %s218_s14 = scalar_lea.vmem [#allocation5], %s912_s7 }
  0x1c   : > { %s229_s22 = sshll.u32 %s218_s14, 4  ;;  %s215_s24 = scalar_lea.sflag [#allocation6], %s214_s6  ;;  %s230_s22 = int_to_ptr.vmem [resolvable:$true] %s229_s22 }
  0x1d   : > { %s247_s23 = scalar_lea.hbm %s1515_s2, %s939_s9  ;;  %p918_p1 = scmp.ge.s32.totalorder %s1239_s20, 1 }
  0x1e   : > { %p256_p2 = scmp.lt.s32.totalorder %s1239_s20, 3  ;;  %s910_s10 = sshll.u32 %s195_s5, 2 }
  0x1f   : > { %s911_s11 = sshll.u32 %s1235_s19, 2  ;;  %s199_s17 = scalar_lea.vmem [#allocation2], %s910_s10 }
  0x20   : > { %p1360_p3 = pnand %p918_p1, %p256_p2  ;;  %s240_s25 = scalar_lea.vmem [#allocation7], %s912_s7 }
  0x21   : > { %s225_s12 = scalar_lea.hbm %s1529_s1, %s939_s9  ;;  %s203_s1 = scalar_lea.hbm %s1513_s0, %s911_s11 }
  0x22   : > { %s227_s13 = sshll.u32 %s225_s12, 4  ;;  %s205_s6 = sshll.u32 %s203_s1, 4  ;;  %s228_s13 = int_to_ptr.hbm [resolvable:$true] %s227_s13  ;;  %s206_s6 = int_to_ptr.hbm [resolvable:$true] %s205_s6 }
  0x23   : > { %959 = dma.hbm_to_vmem [thread:$0]  (!%p1345_p0), %s228_s13, 128, %s230_s22, %s215_s24  }
  0x24   : > { %s207_s13 = sshll.u32 %s199_s17, 4  ;;  %s196_s22 = scalar_lea.sflag [#allocation3], %s195_s5  ;;  %s208_s13 = int_to_ptr.vmem [resolvable:$true] %s207_s13 }
  0x25   : > { %956 = dma.hbm_to_vmem [thread:$0]  (!%p1345_p0), %s206_s6, 64, %s208_s13, %s196_s22  }
  0x26   : > { %s249_s9 = sshll.u32 %s247_s23, 4  ;;  %s251_s26 = sshll.u32 %s240_s25, 4  ;;  %s250_s9 = int_to_ptr.hbm [resolvable:$true] %s249_s9  ;;  %s252_s26 = int_to_ptr.vmem [resolvable:$true] %s251_s26 }
  0x27   : > { %962 = dma.hbm_to_vmem [thread:$0]  (!%p1345_p0), %s250_s9, 128, %s252_s26, %s215_s24  }
  0x28   : > { %260 = sbr.rel (%p1360_p3) target bundleno = 203 (0xcb), region = 32  ;;  %s1375_s1 = sand.u32 (!%p1360_p3), 1, %s1223_s16  }
  0x29   : > { %s919_s17 = sshll.u32 (!%p1360_p3), %s1375_s1, 2  ;;  %s263_s5 = scalar_lea.sflag (!%p1360_p3), [#allocation3], %s1375_s1 }
  0x2a   : > { %s266_s10 = scalar_lea.vmem (!%p1360_p3), [#allocation2], %s919_s17 }
  0x2d   : > { %1202 = dma.done.wait (%p1324_p8), %s263_s5, 64  }
  0x2e   : > { %1204 = vsyncadd (%p1324_p8), %s263_s5, 4294967232  ;;  %s272_s23 = sand.u32 1, %s1304_s21   ;;  %s1385_s29 = sshll.u32 %s1375_s1, 3 }
  0x2f   : > { %s273_s7 = scalar_lea.sflag [#allocation6], %s272_s23  ;;  %s276_s8 = scalar_lea.vmem [#allocation5], %s1385_s29 }
  0x30   : > { %1206 = dma.done.wait (%p1324_p8), %s273_s7, 256  }
  0x31   : > { %1208 = vsyncadd (%p1324_p8), %s273_s7, 4294967040  ;;  %v332_v0 = vld [vmem:[%s266_s10] sm:$0xf]  ;;  %v1241_v26 = vmov 683565275   ;;  %s941_s21 = sshll.u32 %s1231_s18, 3 }
  0x32   : > { %v924_v1 = vmul.f32 -1.442695, %v332_v0  ;;  %v1242_v28 = vmov 2475754826   ;;  %v1243_v30 = vmov 2131351028   ;;  %s718_s18 = scalar_lea.hbm %s1516_s3, %s941_s21  ;;  %s735_s6 = scalar_lea.hbm %s1517_s4, %s941_s21 }
  0x33   : > { %v1244_v32 = vmov 2102212464   ;;  %v1245_v34 = vmov 920167782   ;;  %v1246_v40 = vmov 1326507024  }
  0x34   : > { %1027 = vpow2.f32 %v924_v1  ;;  %s286_s27 = scalar_lea.vmem [#allocation7], %s1385_s29  ;;  %s319_s13 = scalar_lea.vmem [#allocation8], %s1385_s29 }
  0x35   : > { %s1454_s22 = sshll.u32 %s319_s13, 4  ;;  %s326_s9 = scalar_lea.vmem [#allocation9], %s1385_s29  ;;  %s721_s22 = int_to_ptr.vmem [resolvable:$true] %s1454_s22 }
  0x36   : > { %s1457_s25 = sshll.u32 %s326_s9, 4  ;;  %s722_s26 = sshll.u32 %s718_s18, 4  ;;  %s738_s25 = int_to_ptr.vmem [resolvable:$true] %s1457_s25  ;;  %s723_s26 = int_to_ptr.hbm [resolvable:$true] %s722_s26 }
  0x37   : > { %s739_s17 = sshll.u32 %s735_s6, 4  ;;  %s700_s5 = scalar_lea.sflag [#allocation4], %s1375_s1  ;;  %s1462_s17 = int_to_ptr.hbm [resolvable:$true] %s739_s17 }
  0x38   : > { %s1135_s10 = sshra.s32 %s723_s26, 4  ;;  %s1136_s10 = int_to_ptr.hbm [resolvable:$true] %s1135_s10 }
  0x39   : > { %s1137_s23 = scalar_lea.hbm %s1136_s10, 8  ;;  %p1142_p7 = scmp.lt.s32.totalorder %s1136_s10, %s1516_s3 }
  0x3a   : > { %v1028_v2 = vpop.eup %1027  ;;  %p1138_p4 = scmp.ne.s32.totalorder %s1136_s10, %s1137_s23 }
  0x3b   : > { %v336_v3 = vadd.f32 1.0, %v1028_v2 }
  0x3c   : > { %p1139_p5 = pnand %p1138_p4, %p1328_p9 }
  0x3d   : > { %1029 = vrcp.f32 %v336_v3  ;;  %v348_v6 = vand.u32 2147483648, %v336_v3  ;;  %vm342_vm0 = vweird.f32 %v336_v3  ;;  %v346_v8 = vand.u32 2147483647, %v336_v3 }
  0x3e   : > { %p1140_p6 = pneg %p1139_p5 }
  0x3f   : > { %v349_v10 = vor.u32 1.1754944e-38, %v348_v6  ;;  %vm347_vm3 = vcmp.eq.f32.partialorder %v346_v8, 8.507059e+37 }
  0x43   : > { %v1030_v4 = vpop.eup %1029 }
  0x44   : > { %v338_v5 = vmul.f32 %v1030_v4, %v336_v3  ;;  %vm343_vm1 = vweird.f32 %v1030_v4 }
  0x45   : > { %vm344_vm2 = vmor %vm342_vm0, %vm343_vm1 }
  0x46   : > { %v339_v7 = vsub.f32 1.0, %v338_v5 }
  0x48   : > { %v340_v9 = vmul.f32 %v1030_v4, %v339_v7 }
  0x4a   : > { %v341_v11 = vadd.f32 %v1030_v4, %v340_v9 }
  0x4c   : > { %v345_v12 = vsel %vm344_vm2, %v1030_v4, %v341_v11 }
  0x4d   : > { %v350_v13 = vsel %vm347_vm3, %v349_v10, %v345_v12 }
  0x4e   : > { %v1392_v14 = vmul.f32 6.2831855, %v350_v13 }
  0x50   : > { %v358_v15 = vand.u32 2139095040, %v1392_v14  ;;  %v355_v17 = vand.u32 2147483647, %v1392_v14  ;;  %vm357_vm0 = vcmp.lt.s32.totalorder %v1392_v14, 0 }
  0x52   : > { %v359_v16 = vshrl.u32 %v358_v15, 23  ;;  %v362_v20 = vand.u32 8388607, %v355_v17  ;;  %v1247_v15 = vmov 0   ;;  %vm356_vm1 = vcmp.le.f32.partialorder %v355_v17, 0.7853982 }
  0x54   : > { %v925_v18 = vadd.s32 4294967169, %v359_v16  ;;  %v363_v23 = vor.u32 8388608, %v362_v20 }
  0x56   : > { %v365_v19 = vadd.s32 1, %v925_v18  ;;  %v1401_v42 = vshll.u32 %v363_v23, 8 }
  0x58   : > { %vm366_vm4 = vcmp.gt.s32.totalorder %v365_v19, 0  ;;  %v404_v54 = vand.u32 65535, %v1401_v42  ;;  %v405_v55 = vshrl.u32 %v1401_v42, 16 }
  0x59   : > { %v367_v21 = vsel %vm366_vm4, %v365_v19, 0 }
  0x5a   : > { %v369_v22 = vand.u32 31, %v367_v21  ;;  %v1398_v24 = vshrl.u32 %v367_v21, 5 }
  0x5c   : > { %v370_v25 = vsub.s32 32, %v369_v22  ;;  %v372_v27 = vshll.u32 %v1241_v26, %v369_v22  ;;  %v375_v29 = vshll.u32 %v1242_v28, %v369_v22  ;;  %v378_v31 = vshll.u32 %v1243_v30, %v369_v22 }
  0x5d   : > { %v381_v33 = vshll.u32 %v1244_v32, %v369_v22  ;;  %v384_v35 = vshll.u32 %v1245_v34, %v369_v22  ;;  %vm387_vm5 = vcmp.lt.s32.totalorder %v1398_v24, 1  ;;  %vm390_vm6 = vcmp.lt.s32.totalorder %v1398_v24, 4 }
  0x5e   : > { %v373_v36 = vshrl.u32 %v1242_v28, %v370_v25  ;;  %v376_v37 = vshrl.u32 %v1243_v30, %v370_v25  ;;  %v379_v38 = vshrl.u32 %v1244_v32, %v370_v25  ;;  %v382_v39 = vshrl.u32 %v1245_v34, %v370_v25 }
  0x5f   : > { %v385_v41 = vshrl.u32 %v1246_v40, %v370_v25  ;;  %vm389_vm7 = vcmp.lt.s32.totalorder %v1398_v24, 3  ;;  %vm388_vm8 = vcmp.lt.s32.totalorder %v1398_v24, 2  ;;  %v371_v62 = vshrl.u32 %v1241_v26, %v370_v25 }
  0x60   : > { %v374_v43 = vor.u32 %v373_v36, %v372_v27  ;;  %v377_v44 = vor.u32 %v376_v37, %v375_v29  ;;  %v380_v45 = vor.u32 %v379_v38, %v378_v31  ;;  %v383_v46 = vor.u32 %v382_v39, %v381_v33 }
  0x61   : > { %v386_v47 = vor.u32 %v385_v41, %v384_v35 }
  0x62   : > { %v395_v48 = vsel %vm387_vm5, %v374_v43, %v377_v44  ;;  %v399_v49 = vsel %vm387_vm5, %v377_v44, %v380_v45  ;;  %v396_v50 = vsel %vm390_vm6, %v383_v46, 920167782  ;;  %v391_v11 = vsel %vm387_vm5, %v371_v62, %v374_v43 }
  0x63   : > { %v400_v51 = vsel %vm390_vm6, %v386_v47, 1326507024  ;;  %v397_v52 = vsel %vm389_vm7, %v380_v45, %v396_v50  ;;  %v392_v13 = vsel %vm390_vm6, %v380_v45, 2102212464 }
  0x64   : > { %v401_v53 = vsel %vm389_vm7, %v383_v46, %v400_v51  ;;  %v398_v56 = vsel %vm388_vm8, %v395_v48, %v397_v52  ;;  %v393_v26 = vsel %vm389_vm7, %v377_v44, %v392_v13 }
  0x65   : > { %v402_v57 = vsel %vm388_vm8, %v399_v49, %v401_v53  ;;  %v428_v60 = vand.u32 65535, %v398_v56  ;;  %v429_v61 = vshrl.u32 %v398_v56, 16  ;;  %v394_v34 = vsel %vm388_vm8, %v391_v11, %v393_v26 }
  0x66   : > { %v406_v58 = vand.u32 65535, %v402_v57  ;;  %v407_v59 = vshrl.u32 %v402_v57, 16  ;;  %v448_v38 = vmul.u32 %v1401_v42, %v394_v34  ;;  %vm498_vm8 = vweird.f32 %v1392_v14 }
  0x67   : > { %v430_v2 = vmul.u32 %v428_v60, %v404_v54  ;;  %v431_v3 = vmul.u32 %v429_v61, %v404_v54  ;;  %v432_v4 = vmul.u32 %v428_v60, %v405_v55  ;;  %v433_v8 = vmul.u32 %v429_v61, %v405_v55 }
  0x68   : > { %v408_v63 = vmul.u32 %v406_v58, %v404_v54  ;;  %v409_v0 = vmul.u32 %v407_v59, %v404_v54  ;;  %v410_v1 = vmul.u32 %v406_v58, %v405_v55  ;;  %v411_v5 = vmul.u32 %v407_v59, %v405_v55 }
  0x69   : > { %v434_v9 = vshll.u32 %v431_v3, 16  ;;  %v436_v10 = vshll.u32 %v432_v4, 16  ;;  %v435_v23 = vshrl.u32 %v431_v3, 16  ;;  %v437_v30 = vshrl.u32 %v432_v4, 16 }
  0x6a   : > { %v412_v6 = vshll.u32 %v409_v0, 16  ;;  %v414_v7 = vshll.u32 %v410_v1, 16  ;;  %v413_v19 = vshrl.u32 %v409_v0, 16  ;;  %v415_v27 = vshrl.u32 %v410_v1, 16 }
  0x6b   : > { %vm438_vm10 = vc.u32 %v430_v2, %v434_v9  ;;  %v440_v18 = vadd.s32 %v434_v9, %v430_v2 }
  0x6c   : > { %vm416_vm9 = vc.u32 %v408_v63, %v412_v6  ;;  %v418_v12 = vadd.s32 %v412_v6, %v408_v63  ;;  %v439_v21 = vsel %vm438_vm10, 1, %v1247_v15  ;;  %vm679_vm10 = vcmask 1045508  }
  0x6d   : > { %v417_v16 = vsel %vm416_vm9, 1, %v1247_v15  ;;  %v441_v25 = vadd.s32 %v439_v21, %v433_v8  ;;  %vm442_vm12 = vc.u32 %v440_v18, %v436_v10  ;;  %v444_v33 = vadd.s32 %v440_v18, %v436_v10 }
  0x6e   : > { %v419_v20 = vadd.s32 %v417_v16, %v411_v5  ;;  %vm420_vm11 = vc.u32 %v418_v12, %v414_v7  ;;  %v443_v29 = vsel %vm442_vm12, 1, %v1247_v15  ;;  %vm677_vm9 = vcmask 1041408  }
  0x6f   : > { %v421_v22 = vsel %vm420_vm11, 1, %v1247_v15  ;;  %v445_v31 = vadd.s32 %v443_v29, %v441_v25  ;;  %vm681_vm11 = vcmask 1043456  }
  0x70   : > { %v423_v28 = vadd.s32 %v421_v22, %v419_v20 }
  0x71   : > { %v446_v35 = vadd.s32 %v445_v31, %v435_v23 }
  0x72   : > { %v424_v32 = vadd.s32 %v423_v28, %v413_v19 }
  0x73   : > { %v447_v37 = vadd.s32 %v446_v35, %v437_v30 }
  0x74   : > { %v425_v36 = vadd.s32 %v424_v32, %v415_v27 }
  0x75   : > { %v451_v39 = vadd.s32 1, %v447_v37 }
  0x76   : > { %vm450_vm13 = vc.u32 %v425_v36, %v444_v33  ;;  %v449_v24 = vadd.s32 %v444_v33, %v425_v36 }
  0x77   : > { %v452_v40 = vsel %vm450_vm13, %v451_v39, %v447_v37 }
  0x78   : > { %v453_v41 = vadd.s32 %v452_v40, %v448_v38 }
  0x7a   : > { %v454_v43 = vadd.s32 536870912, %v453_v41 }
  0x7c   : > { %v455_v44 = vshrl.u32 %v454_v43, 30 }
  0x7e   : > { %v456_v45 = vshll.u32 %v455_v44, 30  ;;  %v479_v62 = vsub.s32 4, %v455_v44 }
  0x80   : > { %v457_v46 = vsub.s32 %v453_v41, %v456_v45  ;;  %v480_v1 = vsel %vm357_vm0, %v479_v62, %v455_v44  ;;  %v353_v44 = vld [vmem:[%s276_s8] sm:$0xff]  ;;  %v354_v45 = vld [vmem:[%s286_s27] sm:$0xff]  ;;  %s1141_s8 = scalar_lea.hbm %s1516_s3, 16 }
  0x81   : > { %v482_v4 = vsel %vm356_vm1, 0, %v480_v1  ;;  %p1143_p8 = scmp.lt.s32.totalorder %s1141_s8, %s1137_s23 }
  0x82   : > { %vm458_vm14 = vcmp.lt.s32.totalorder %v457_v46, 0  ;;  %v459_v47 = vsub.s32 0, %v457_v46  ;;  %v658_v9 = vadd.s32 3, %v482_v4  ;;  %v499_v15 = vand.u32 3, %v482_v4 }
  0x83   : > { %p1144_p10 = por %p1143_p8, %p1142_p7 }
  0x84   : > { %v460_v48 = vsel %vm458_vm14, %v459_v47, %v457_v46  ;;  %v659_v16 = vand.u32 3, %v658_v9  ;;  %vm504_vm2 = vcmp.eq.s32.totalorder %v499_v15, 2  ;;  %vm500_vm4 = vcmp.lt.s32.totalorder %v499_v15, 2 }
  0x85   : > { %v461_v49 = vclz %v460_v48  ;;  %vm501_vm5 = vcmp.eq.s32.totalorder %v499_v15, 0  ;;  %p1145_p13 = pnand %p1144_p10, %p1140_p6 }
  0x86   : > { %vm664_vm3 = vcmp.eq.s32.totalorder %v659_v16, 2  ;;  %vm661_vm6 = vcmp.eq.s32.totalorder %v659_v16, 0  ;;  %vm660_vm7 = vcmp.lt.s32.totalorder %v659_v16, 2 }
  0x87   : > { %v926_v50 = vadd.s32 4294967294, %v461_v49 }
  0x89   : > { %vm927_vm15 = vcmp.lt.s32.totalorder %v926_v50, 0 }
  0x8a   : > { %v464_v51 = vsel %vm927_vm15, 0, %v926_v50 }
  0x8b   : > { %v465_v52 = vsub.s32 32, %v464_v51  ;;  %v466_v53 = vshll.u32 %v457_v46, %v464_v51  ;;  %v469_v54 = vsub.s32 4294967266, %v464_v51 }
  0x8d   : > { %v467_v42 = vshrl.u32 %v449_v24, %v465_v52  ;;  %v470_v55 = vadd.s32 127, %v469_v54 }
  0x8f   : > { %v468_v56 = vor.u32 %v467_v42, %v466_v53  ;;  %v471_v57 = vshll.u32 %v470_v55, 23 }
  0x91   : > { %v472_v58 = vor.u32 4788187, %v471_v57  ;;  %v475_v59 = vcvt.s32.f32 %v468_v56 }
  0x93   : > { %v473_v60 = vand.u32 2147483647, %v472_v58 }
  0x95   : > { %v476_v61 = vmul.f32 %v475_v59, %v473_v60 }
  0x97   : > { %v477_v63 = vxor.u32 2147483648, %v476_v61 }
  0x99   : > { %v478_v0 = vsel %vm357_vm0, %v477_v63, %v476_v61 }
  0x9a   : > { %v481_v2 = vsel %vm356_vm1, %v1392_v14, %v478_v0 }
  0x9b   : > { %v483_v3 = vmul.f32 %v481_v2, %v481_v2 }
  0x9d   : > { %v484_v5 = vmul.f32 -0.001358992, %v483_v3  ;;  %v491_v6 = vmul.f32 -0.00019511016, %v483_v3 }
  0x9f   : > { %v485_v7 = vadd.f32 0.041655596, %v484_v5  ;;  %v492_v8 = vadd.f32 0.008332121, %v491_v6 }
  0xa1   : > { %v486_v10 = vmul.f32 %v485_v7, %v483_v3  ;;  %v493_v11 = vmul.f32 %v492_v8, %v483_v3 }
  0xa3   : > { %v487_v12 = vadd.f32 -0.4999988, %v486_v10  ;;  %v494_v13 = vadd.f32 -0.16666654, %v493_v11 }
  0xa5   : > { %v488_v18 = vmul.f32 %v487_v12, %v483_v3  ;;  %v495_v17 = vmul.f32 %v494_v13, %v483_v3 }
  0xa7   : > { %v489_v19 = vadd.f32 1.0, %v488_v18  ;;  %v496_v20 = vadd.f32 1.0, %v495_v17 }
  0xa9   : > { %v497_v21 = vmul.f32 %v496_v20, %v481_v2  ;;  %v505_v22 = vxor.u32 2147483648, %v489_v19 }
  0xab   : > { %v502_v23 = vxor.u32 2147483648, %v497_v21  ;;  %v506_v25 = vsel %vm504_vm2, %v505_v22, %v497_v21  ;;  %v666_v26 = vsel %vm664_vm3, %v505_v22, %v497_v21 }
  0xad   : > { %v503_v27 = vsel %vm501_vm5, %v489_v19, %v502_v23  ;;  %v663_v28 = vsel %vm661_vm6, %v489_v19, %v502_v23 }
  0xae   : > { %v507_v29 = vsel %vm500_vm4, %v503_v27, %v506_v25  ;;  %v667_v30 = vsel %vm660_vm7, %v663_v28, %v666_v26 }
  0xaf   : > { %v508_v31 = vsel %vm498_vm8, nan, %v507_v29  ;;  %v668_v32 = vsel %vm498_vm8, nan, %v667_v30 }
  0xb0   : > { %v510_v33 = vperm.slane %v508_v31, 0  ;;  %v511_v34 = vperm.slane %v508_v31, 1  ;;  %v512_v35 = vperm.slane %v508_v31, 2  ;;  %v513_v36 = vperm.slane %v508_v31, 3 }
  0xb1   : > { %v670_v37 = vperm.slane %v668_v32, 0  ;;  %v671_v38 = vperm.slane %v668_v32, 1  ;;  %v672_v39 = vperm.slane %v668_v32, 2  ;;  %v673_v40 = vperm.slane %v668_v32, 3 }
  0xb2   : > { %v674_v14 = vrot.slane %v511_v34, 6  ;;  %v675_v41 = vrot.slane %v512_v35, 4  ;;  %v676_v43 = vrot.slane %v513_v36, 2 }
  0xb3   : > { %v685_v46 = vrot.slane %v671_v38, 6  ;;  %v686_v47 = vrot.slane %v672_v39, 4  ;;  %v687_v48 = vrot.slane %v673_v40, 2 }
  0xb4   : > { %v678_v49 = vsel %vm677_vm9, %v510_v33, %v674_v14  ;;  %v680_v50 = vsel %vm679_vm10, %v675_v41, %v676_v43 }
  0xb5   : > { %v682_v24 = vsel %vm681_vm11, %v678_v49, %v680_v50  ;;  %v688_v51 = vsel %vm677_vm9, %v670_v37, %v685_v46  ;;  %v689_v52 = vsel %vm679_vm10, %v686_v47, %v687_v48 }
  0xb6   : > { %v684_v53 = vmul.f32 %v682_v24, %v353_v44  ;;  %v690_v54 = vsel %vm681_vm11, %v688_v51, %v689_v52  ;;  %v696_v42 = vmul.f32 %v682_v24, %v354_v45 }
  0xb7   : > { %v692_v55 = vmul.f32 %v690_v54, %v354_v45  ;;  %v695_v56 = vmul.f32 %v690_v54, %v353_v44 }
  0xb9   : > { %v693_v57 = vsub.f32 %v684_v53, %v692_v55  ;;  %v697_v58 = vadd.f32 %v696_v42, %v695_v56 }
  0xbb   : > { %694 = vst [vmem:[%s319_s13] sm:$0xff] %v693_v57 }
  0xbc   : > { %698 = vst [vmem:[%s326_s9] sm:$0xff] %v697_v58 }
  0xbd   : > { %1148 = shalt.err (!%p1145_p13)
}
  0xbe   : > { %949 = dma.vmem_to_hbm [thread:$0]  (%p1328_p9), %s721_s22, 128, %s723_s26, %s700_s5  }
  0xbf   : > { %s705_s24 = scalar_lea.sflag [#allocation10], %s1375_s1  ;;  %s1163_s11 = sshra.s32 %s1462_s17, 4  ;;  %s1164_s11 = int_to_ptr.hbm [resolvable:$true] %s1163_s11 }
  0xc0   : > { %s1165_s18 = scalar_lea.hbm %s1164_s11, 8  ;;  %s1169_s6 = scalar_lea.hbm %s1517_s4, 16 }
  0xc1   : > { %p1166_p0 = scmp.ne.s32.totalorder %s1164_s11, %s1165_s18  ;;  %p1170_p3 = scmp.lt.s32.totalorder %s1164_s11, %s1517_s4 }
  0xc2   : > { %p1171_p4 = scmp.lt.s32.totalorder %s1169_s6, %s1165_s18 }
  0xc3   : > { %p1167_p1 = pnand %p1166_p0, %p1328_p9 }
  0xc4   : > { %p1172_p5 = por %p1171_p4, %p1170_p3 }
  0xc5   : > { %p1168_p2 = pneg %p1167_p1 }
  0xc7   : > { %p1173_p6 = pnand %p1172_p5, %p1168_p2 }
  0xc9   : > { %1176 = shalt.err (!%p1173_p6)
}
  0xca   : > { %950 = dma.vmem_to_hbm [thread:$0]  (%p1328_p9), %s738_s25, 128, %s1462_s17, %s705_s24  }
  0xcb PF: > { %s751_s1 = sand.u32 1, %s1219_s15   ;;  %p964_p7 = pnand %p909_p12, %p1335_p11 }
  0xcc   : > { %s752_s22 = scalar_lea.sflag [#allocation4], %s751_s1 }
  0xcd   : > { %p965_p8 = pneg %p964_p7 }
  0xcf   : > { %1210 = dma.done.wait (%p965_p8), %s752_s22, 128  }
  0xd0   : > { %1212 = vsyncadd (%p965_p8), %s752_s22, 4294967168  ;;  %s762_s26 = scalar_lea.sflag [#allocation10], %s751_s1 }
  0xd1   : > { %1214 = dma.done.wait (%p965_p8), %s762_s26, 128  }
  0xd2   : > { %1216 = vsyncadd (%p965_p8), %s762_s26, 4294967168  ;;  %s27_s20 = sadd.s32 1, %s1239_s20   ;;  %s1531_s28 = sld [smem:[#allocation15_spill]] }
  0xd3   : > { %p24_p10 = scmp.ge.s32.totalorder %s27_s20, 4   ;;  %s1532_s17 = sld [smem:[#allocation17_spill]] }
  0xd4   : > { %s1533_s25 = sld [smem:[#allocation16_spill]]  ;;  %s1534_s15 = smov %s1223_s16 }
  0xd5   : > { %s1536_s18 = smov %s1235_s19 }
  0xd6   :  { %26 = sbr.rel (!%p24_p10) target bundleno = 12 (0xc), region = 118 }
  0xd8   : > { %s1535_s16 = smov %s1531_s28 }
  0xda   : > { %s1537_s19 = smov %s1533_s25 }
  0xdb   :  { %768 = vsyncpa [#allocation3], 1 }
  0xdc   :  { %770 = vsyncpa [#allocation3 + $0x1], 1 }
  0xdd   :  { %771 = vsyncpa [#allocation6], 1 }
  0xde   :  { %773 = vsyncpa [#allocation6 + $0x1], 1 }
  0xdf   :  { %774 = vsyncpa [#allocation4], 1 }
  0xe0   :  { %776 = vsyncpa [#allocation4 + $0x1], 1 }
  0xe1   :  { %777 = vsyncpa [#allocation10], 1 }
  0xe2   :  { %779 = vsyncpa [#allocation10 + $0x1], 1 }

</bundles_post_ra>
